<compile_context>
chip_gen: v7x
topology: tpu7x:2x2x1
jax: 0.10.0
libtpu: 0.0.40
codegen_flags: <defaults>
</compile_context>

<pallas_src>
from functools import partial

import jax
import jax.numpy as jnp
from jax.experimental import pallas as pl
from jax.experimental.pallas import tpu as pltpu

LANES = 128   # lane width of a vreg
SUB = 8       # f32 sublane count


def mlp_kernel(x_ref, w1_ref, b1_ref, w2_ref, b2_ref, o_ref, *,
               in_features, hidden):
    """Fused Linear(4->3) + ReLU + Linear(3->2), all on the VPU.

    x_ref : (TILE_B, 128)  input features in lanes [0, in_features)
    w1_ref: (8, 128)       rows [0,in_features) x cols [0,hidden) hold W1
    b1_ref: (1, 128)       cols [0,hidden) hold b1
    w2_ref: (8, 128)       rows [0,hidden) x cols [0,out) hold W2
    b2_ref: (1, 128)       cols [0,out) hold b2
    o_ref : (TILE_B, 128)  lane-dense output; cols [0,out) are meaningful
    """
    x = x_ref[...]
    w1 = w1_ref[...]
    w2 = w2_ref[...]

    # ---- Layer 1: Linear(in_features -> hidden), unrolled broadcast-FMAs ----
    h = b1_ref[...]                                  # (1, 128)
    for k in range(in_features):                     # unrolled at trace time
        h = h + x[:, k:k + 1] * w1[k:k + 1, :]       # (TILE_B,1)*(1,128)
    # ---- ReLU (f32 on the VPU) ----
    h = jnp.maximum(h, 0.0)
    # ---- Layer 2: Linear(hidden -> out), unrolled broadcast-FMAs ----
    y = b2_ref[...]
    for k in range(hidden):
        y = y + h[:, k:k + 1] * w2[k:k + 1, :]
    o_ref[...] = y.astype(o_ref.dtype)


def net_forward(x, w1, b1, w2, b2, *, tile_b=512):
    """x: (B, 4) f32.  w1: (4, 3), b1: (3,)/(1,3), w2: (3, 2), b2: (2,)/(1,2)."""
    B, in_f = x.shape
    hid = w1.shape[1]
    out_f = w2.shape[1]

    # Batch tile: multiple of 8 sublanes, capped at tile_b, padded batch.
    tile_b = min(tile_b, pl.cdiv(B, SUB) * SUB)
    tile_b = max(SUB, (tile_b // SUB) * SUB)
    b_pad = pl.cdiv(B, tile_b) * tile_b

    # Zero-padded, lane-dense operands.
    xp = jnp.zeros((b_pad, LANES), jnp.float32).at[:B, :in_f].set(x)
    w1p = jnp.zeros((SUB, LANES), jnp.float32).at[:in_f, :hid].set(w1)
    b1p = jnp.zeros((1, LANES), jnp.float32).at[:, :hid].set(
        jnp.reshape(b1, (1, hid)))
    w2p = jnp.zeros((SUB, LANES), jnp.float32).at[:hid, :out_f].set(w2)
    b2p = jnp.zeros((1, LANES), jnp.float32).at[:, :out_f].set(
        jnp.reshape(b2, (1, out_f)))

    grid = (b_pad // tile_b,)
    out = pl.pallas_call(
        partial(mlp_kernel, in_features=in_f, hidden=hid),
        out_shape=jax.ShapeDtypeStruct((b_pad, LANES), jnp.float32),
        grid=grid,
        in_specs=[
            pl.BlockSpec((tile_b, LANES), lambda i: (i, 0)),   # x: tiled batch
            pl.BlockSpec((SUB, LANES), lambda i: (0, 0)),      # w1: resident
            pl.BlockSpec((1, LANES), lambda i: (0, 0)),        # b1: resident
            pl.BlockSpec((SUB, LANES), lambda i: (0, 0)),      # w2: resident
            pl.BlockSpec((1, LANES), lambda i: (0, 0)),        # b2: resident
        ],
        out_specs=pl.BlockSpec((tile_b, LANES), lambda i: (i, 0)),
        compiler_params=pltpu.CompilerParams(
            dimension_semantics=("parallel",)),
    )(xp, w1p, b1p, w2p, b2p)
    return out[:B, :out_f]


def init_params(key):
    """Deterministic init mirroring nn.Linear's U(-1/sqrt(fan_in), 1/sqrt(fan_in)).

    Weights stored as (in_features, out_features) — transposed vs PyTorch.
    """
    k1, k2, k3, k4 = jax.random.split(key, 4)
    bound1 = 1.0 / jnp.sqrt(4.0)
    bound2 = 1.0 / jnp.sqrt(3.0)
    w1 = jax.random.uniform(k1, (4, 3), jnp.float32, -bound1, bound1)
    b1 = jax.random.uniform(k2, (3,), jnp.float32, -bound1, bound1)
    w2 = jax.random.uniform(k3, (3, 2), jnp.float32, -bound2, bound2)
    b2 = jax.random.uniform(k4, (2,), jnp.float32, -bound2, bound2)
    return w1, b1, w2, b2


def reference_forward(x, w1, b1, w2, b2):
    h = jnp.maximum(x @ w1 + b1[None, :], 0.0)
    return h @ w2 + b2[None, :]


if __name__ == "__main__":
    key = jax.random.PRNGKey(0)
    kx, kx2, kp = jax.random.split(key, 3)

    w1, b1, w2, b2 = init_params(kp)

    # Small batch consistent with the module: forward expects (batch, 4).
    x = jax.random.uniform(kx, (4, 4), jnp.float32)
    out = jax.block_until_ready(net_forward(x, w1, b1, w2, b2))
    ref = reference_forward(x, w1, b1, w2, b2)
    assert out.shape == (4, 2), out.shape
    assert jnp.allclose(out, ref, atol=1e-5, rtol=1e-5), (out, ref)

    # A second check with a non-multiple-of-tile batch to exercise the grid
    # + padding path (still small).
    x2 = jax.random.uniform(kx2, (1029, 4), jnp.float32)
    out2 = jax.block_until_ready(net_forward(x2, w1, b1, w2, b2))
    ref2 = reference_forward(x2, w1, b1, w2, b2)
    assert out2.shape == (1029, 2), out2.shape
    assert jnp.allclose(out2, ref2, atol=1e-5, rtol=1e-5)

    print("KERNEL_OK")
</pallas_src>

<mosaic_0001>
module attributes {stable_mosaic.version = 11 : i64} {
  func.func @mlp_kernel(%arg0: i32, %arg1: memref<8x128xf32, #tpu.memory_space<vmem>>, %arg2: memref<8x128xf32, #tpu.memory_space<vmem>>, %arg3: memref<1x128xf32, #tpu.memory_space<vmem>>, %arg4: memref<8x128xf32, #tpu.memory_space<vmem>>, %arg5: memref<1x128xf32, #tpu.memory_space<vmem>>, %arg6: memref<8x128xf32, #tpu.memory_space<vmem>>) attributes {dimension_semantics = [#tpu.dimension_semantics<parallel>], iteration_bounds = array<i64: 1>, scalar_prefetch = 0 : i64, scratch_operands = 0 : i64, tpu.core_type = #tpu.core_type<tc>, window_params = [{transform_indices = @transform_0, window_bounds = array<i64: 8, 128>}, {pipeline_mode = #tpu.pipeline_mode<synchronous>, transform_indices = @transform_1, window_bounds = array<i64: 8, 128>}, {pipeline_mode = #tpu.pipeline_mode<synchronous>, transform_indices = @transform_2, window_bounds = array<i64: 1, 128>}, {pipeline_mode = #tpu.pipeline_mode<synchronous>, transform_indices = @transform_3, window_bounds = array<i64: 8, 128>}, {pipeline_mode = #tpu.pipeline_mode<synchronous>, transform_indices = @transform_4, window_bounds = array<i64: 1, 128>}, {transform_indices = @transform_5, window_bounds = array<i64: 8, 128>}]} {
    %c0 = arith.constant 0 : index
    %c0_0 = arith.constant 0 : index
    %0 = vector.load %arg1[%c0, %c0_0] : memref<8x128xf32, #tpu.memory_space<vmem>>, vector<8x128xf32>
    %c0_1 = arith.constant 0 : index
    %c0_2 = arith.constant 0 : index
    %1 = vector.load %arg2[%c0_1, %c0_2] : memref<8x128xf32, #tpu.memory_space<vmem>>, vector<8x128xf32>
    %c0_3 = arith.constant 0 : index
    %c0_4 = arith.constant 0 : index
    %2 = vector.load %arg4[%c0_3, %c0_4] : memref<8x128xf32, #tpu.memory_space<vmem>>, vector<8x128xf32>
    %c0_5 = arith.constant 0 : index
    %c0_6 = arith.constant 0 : index
    %3 = vector.load %arg3[%c0_5, %c0_6] : memref<1x128xf32, #tpu.memory_space<vmem>>, vector<1x128xf32>
    %4 = vector.extract_strided_slice %0 {offsets = [0, 0], sizes = [8, 1], strides = [1, 1]} : vector<8x128xf32> to vector<8x1xf32>
    %5 = vector.extract_strided_slice %1 {offsets = [0, 0], sizes = [1, 128], strides = [1, 1]} : vector<8x128xf32> to vector<1x128xf32>
    %6 = vector.broadcast %4 : vector<8x1xf32> to vector<8x128xf32>
    %7 = vector.broadcast %5 : vector<1x128xf32> to vector<8x128xf32>
    %8 = arith.mulf %6, %7 : vector<8x128xf32>
    %9 = vector.broadcast %3 : vector<1x128xf32> to vector<8x128xf32>
    %10 = arith.addf %9, %8 : vector<8x128xf32>
    %11 = vector.extract_strided_slice %0 {offsets = [0, 1], sizes = [8, 1], strides = [1, 1]} : vector<8x128xf32> to vector<8x1xf32>
    %12 = vector.extract_strided_slice %1 {offsets = [1, 0], sizes = [1, 128], strides = [1, 1]} : vector<8x128xf32> to vector<1x128xf32>
    %13 = vector.broadcast %11 : vector<8x1xf32> to vector<8x128xf32>
    %14 = vector.broadcast %12 : vector<1x128xf32> to vector<8x128xf32>
    %15 = arith.mulf %13, %14 : vector<8x128xf32>
    %16 = arith.addf %10, %15 : vector<8x128xf32>
    %17 = vector.extract_strided_slice %0 {offsets = [0, 2], sizes = [8, 1], strides = [1, 1]} : vector<8x128xf32> to vector<8x1xf32>
    %18 = vector.extract_strided_slice %1 {offsets = [2, 0], sizes = [1, 128], strides = [1, 1]} : vector<8x128xf32> to vector<1x128xf32>
    %19 = vector.broadcast %17 : vector<8x1xf32> to vector<8x128xf32>
    %20 = vector.broadcast %18 : vector<1x128xf32> to vector<8x128xf32>
    %21 = arith.mulf %19, %20 : vector<8x128xf32>
    %22 = arith.addf %16, %21 : vector<8x128xf32>
    %23 = vector.extract_strided_slice %0 {offsets = [0, 3], sizes = [8, 1], strides = [1, 1]} : vector<8x128xf32> to vector<8x1xf32>
    %24 = vector.extract_strided_slice %1 {offsets = [3, 0], sizes = [1, 128], strides = [1, 1]} : vector<8x128xf32> to vector<1x128xf32>
    %25 = vector.broadcast %23 : vector<8x1xf32> to vector<8x128xf32>
    %26 = vector.broadcast %24 : vector<1x128xf32> to vector<8x128xf32>
    %27 = arith.mulf %25, %26 : vector<8x128xf32>
    %28 = arith.addf %22, %27 : vector<8x128xf32>
    %cst = arith.constant 0.000000e+00 : f32
    %29 = vector.broadcast %cst : f32 to vector<8x128xf32>
    %30 = arith.maximumf %28, %29 : vector<8x128xf32>
    %c0_7 = arith.constant 0 : index
    %c0_8 = arith.constant 0 : index
    %31 = vector.load %arg5[%c0_7, %c0_8] : memref<1x128xf32, #tpu.memory_space<vmem>>, vector<1x128xf32>
    %32 = vector.extract_strided_slice %30 {offsets = [0, 0], sizes = [8, 1], strides = [1, 1]} : vector<8x128xf32> to vector<8x1xf32>
    %33 = vector.extract_strided_slice %2 {offsets = [0, 0], sizes = [1, 128], strides = [1, 1]} : vector<8x128xf32> to vector<1x128xf32>
    %34 = vector.broadcast %32 : vector<8x1xf32> to vector<8x128xf32>
    %35 = vector.broadcast %33 : vector<1x128xf32> to vector<8x128xf32>
    %36 = arith.mulf %34, %35 : vector<8x128xf32>
    %37 = vector.broadcast %31 : vector<1x128xf32> to vector<8x128xf32>
    %38 = arith.addf %37, %36 : vector<8x128xf32>
    %39 = vector.extract_strided_slice %30 {offsets = [0, 1], sizes = [8, 1], strides = [1, 1]} : vector<8x128xf32> to vector<8x1xf32>
    %40 = vector.extract_strided_slice %2 {offsets = [1, 0], sizes = [1, 128], strides = [1, 1]} : vector<8x128xf32> to vector<1x128xf32>
    %41 = vector.broadcast %39 : vector<8x1xf32> to vector<8x128xf32>
    %42 = vector.broadcast %40 : vector<1x128xf32> to vector<8x128xf32>
    %43 = arith.mulf %41, %42 : vector<8x128xf32>
    %44 = arith.addf %38, %43 : vector<8x128xf32>
    %45 = vector.extract_strided_slice %30 {offsets = [0, 2], sizes = [8, 1], strides = [1, 1]} : vector<8x128xf32> to vector<8x1xf32>
    %46 = vector.extract_strided_slice %2 {offsets = [2, 0], sizes = [1, 128], strides = [1, 1]} : vector<8x128xf32> to vector<1x128xf32>
    %47 = vector.broadcast %45 : vector<8x1xf32> to vector<8x128xf32>
    %48 = vector.broadcast %46 : vector<1x128xf32> to vector<8x128xf32>
    %49 = arith.mulf %47, %48 : vector<8x128xf32>
    %50 = arith.addf %44, %49 : vector<8x128xf32>
    %c0_9 = arith.constant 0 : index
    %c0_10 = arith.constant 0 : index
    %51 = vector.load %arg6[%c0_9, %c0_10] : memref<8x128xf32, #tpu.memory_space<vmem>>, vector<8x128xf32>
    tpu.vector_store %arg6[%c0_9, %c0_10], %50 {strides = array<i32>} : memref<8x128xf32, #tpu.memory_space<vmem>>, vector<8x128xf32>,
    return
  }
  func.func @transform_0(%arg0: i32) -> (i32, i32) {
    %c0_i32 = arith.constant 0 : i32
    %c0_i32_0 = arith.constant 0 : i32
    return %arg0, %c0_i32 : i32, i32
  }
  func.func @transform_1(%arg0: i32) -> (i32, i32) {
    %c0_i32 = arith.constant 0 : i32
    %c0_i32_0 = arith.constant 0 : i32
    %c0_i32_1 = arith.constant 0 : i32
    return %c0_i32, %c0_i32_0 : i32, i32
  }
  func.func @transform_2(%arg0: i32) -> (i32, i32) {
    %c0_i32 = arith.constant 0 : i32
    %c0_i32_0 = arith.constant 0 : i32
    %c0_i32_1 = arith.constant 0 : i32
    return %c0_i32, %c0_i32_0 : i32, i32
  }
  func.func @transform_3(%arg0: i32) -> (i32, i32) {
    %c0_i32 = arith.constant 0 : i32
    %c0_i32_0 = arith.constant 0 : i32
    %c0_i32_1 = arith.constant 0 : i32
    return %c0_i32, %c0_i32_0 : i32, i32
  }
  func.func @transform_4(%arg0: i32) -> (i32, i32) {
    %c0_i32 = arith.constant 0 : i32
    %c0_i32_0 = arith.constant 0 : i32
    %c0_i32_1 = arith.constant 0 : i32
    return %c0_i32, %c0_i32_0 : i32, i32
  }
  func.func @transform_5(%arg0: i32) -> (i32, i32) {
    %c0_i32 = arith.constant 0 : i32
    %c0_i32_0 = arith.constant 0 : i32
    return %arg0, %c0_i32 : i32, i32
  }
}

</mosaic_0001>

<bundles_post_ra>
// kernel: tpu_custom_call.1
= control target key start
LH: loop header
LB: loop body
LE: loop exit
PB: predicated region body
PF: predicated region fallthrough
CT: control target
= control target key end

     0   :  { %10 = vsyncpa [#allocation3], 0  ;;  %s322_s0 = inlined_call_operand.hbm [shape: f32[8,128], index: 0, kind: input, shape index: {}]   ;;  %s323_s1 = inlined_call_operand.hbm [shape: f32[8,128], index: 1, kind: input, shape index: {}]   ;;  %s324_s2 = inlined_call_operand.vmem [shape: f32[1,128], index: 2, kind: input, shape index: {}]   ;;  %s325_s3 = inlined_call_operand.vmem [shape: f32[8,128], index: 3, kind: input, shape index: {}]   ;;  %s326_s4 = inlined_call_operand.vmem [shape: f32[1,128], index: 4, kind: input, shape index: {}]   ;;  %s327_s5 = inlined_call_operand.hbm [shape: f32[8,128], index: 5, kind: output, shape index: {}]  }
   0x1   :  { %11 = vsyncpa [#allocation6], 0 }
   0x2   :  { %12 = vsyncpa [#allocation4], 0  ;;  %s240_s18 = smov [#allocation2]   ;;  %s241_s20 = smov [#allocation5]  }
   0x3   :  { %s19_s19 = sshll.u32 %s240_s18, 4  ;;  %s29_s21 = sshll.u32 %s241_s20, 4  ;;  %s20_s19 = int_to_ptr.vmem [resolvable:$true] %s19_s19  ;;  %s30_s21 = int_to_ptr.vmem [resolvable:$true] %s29_s21 }
   0x4   :  { %s168_s24 = scalar_lea.hbm %s322_s0, 128 }
   0x5   :  { %p169_p0 = scmp.ne.s32.totalorder %s322_s0, %s168_s24  ;;  %p172_p1 = scmp.lt.u32.totalorder %s168_s24, %s322_s0 }
   0x7   :  { %p174_p2 = pnand %p172_p1, %p169_p0 }
   0x9   :  { %177 = shalt.err (!%p174_p2)
}
   0xa   :  { %s178_s29 = scalar_lea.vmem %s20_s19, 128  ;;  %p183_p4 = scmp.lt.s32.totalorder %s20_s19, %s20_s19 }
   0xb   :  { %p179_p3 = scmp.ne.s32.totalorder %s20_s19, %s178_s29  ;;  %p184_p5 = scmp.lt.s32.totalorder %s178_s29, %s178_s29 }
   0xd   :  { %p185_p6 = por %p184_p5, %p183_p4 }
   0xf   :  { %p186_p7 = pnand %p185_p6, %p179_p3 }
  0x11   :  { %189 = shalt.err (!%p186_p7)
}
  0x12   :  { %22 = dma.hbm_to_vmem [thread:$0]  %s322_s0, 128, %s20_s19, [#allocation3]  }
  0x13   :  { %s190_s9 = scalar_lea.hbm %s323_s1, 128 }
  0x14   :  { %p191_p8 = scmp.ne.s32.totalorder %s323_s1, %s190_s9  ;;  %p194_p9 = scmp.lt.u32.totalorder %s190_s9, %s323_s1 }
  0x16   :  { %p196_p10 = pnand %p194_p9, %p191_p8 }
  0x18   :  { %199 = shalt.err (!%p196_p10)
}
  0x19   :  { %s200_s14 = scalar_lea.vmem %s30_s21, 128  ;;  %p205_p12 = scmp.lt.s32.totalorder %s30_s21, %s30_s21 }
  0x1a   :  { %p201_p11 = scmp.ne.s32.totalorder %s30_s21, %s200_s14  ;;  %p206_p13 = scmp.lt.s32.totalorder %s200_s14, %s200_s14 }
  0x1c   :  { %p207_p0 = por %p206_p13, %p205_p12 }
  0x1e   :  { %p208_p1 = pnand %p207_p0, %p201_p11 }
  0x20   :  { %211 = shalt.err (!%p208_p1)
}
  0x21   :  { %32 = dma.hbm_to_vmem [thread:$0]  %s323_s1, 128, %s30_s21, [#allocation6]  }
  0x22   :  { %234 = dma.done.wait [#allocation3], 128  }
  0x23   :  { %235 = vsyncadd [#allocation3], 4294967168 }
  0x24   :  { %236 = dma.done.wait [#allocation6], 128  }
  0x25   :  { %237 = vsyncadd [#allocation6], 4294967168  ;;  %v242_v0 = vmov 0   ;;  %v243_v1 = vmov 2   ;;  %v45_v2 = vld [vmem:[#allocation2] sm:$0xff]  ;;  %v244_v3 = vmov 1   ;;  %v54_v5 = vlaneseq }
  0x26   :  { %161 = vset.pattern.permute.xlu0 %v242_v0  ;;  %163 = vset.pattern.permute.xlu1 %v243_v1  ;;  %v245_v4 = vmov 3   ;;  %v46_v8 = vld [vmem:[#allocation5] sm:$0xff]  ;;  %v152_v17 = vld [vmem:[%s324_s2] ss:$0 sm:$0xff]  ;;  %s246_s20 = smov [#allocation7]  }
  0x27   :  { %51 = vperm.xlu0 %161, %v45_v2   ;;  %77 = vperm.xlu1 %163, %v45_v2   ;;  %v55_v6 = vshrl.u32 %v54_v5, 7  ;;  %v47_v30 = vld [vmem:[%s325_s3] sm:$0xff]  ;;  %s142_s21 = sshll.u32 %s246_s20, 4  ;;  %s143_s21 = int_to_ptr.vmem [resolvable:$true] %s142_s21 }
  0x28   :  { %v153_v34 = vld [vmem:[%s326_s4] ss:$0 sm:$0xff]  ;;  %s212_s3 = scalar_lea.vmem %s143_s21, 128  ;;  %p217_p3 = scmp.lt.s32.totalorder %s143_s21, %s143_s21 }
  0x29   :  { %v56_v7 = vsub.s32 0, %v55_v6  ;;  %v72_v10 = vsub.s32 1, %v55_v6  ;;  %v82_v12 = vsub.s32 2, %v55_v6  ;;  %v92_v14 = vsub.s32 3, %v55_v6  ;;  %p213_p2 = scmp.ne.s32.totalorder %s143_s21, %s212_s3  ;;  %p218_p4 = scmp.lt.s32.totalorder %s212_s3, %s212_s3 }
  0x2b   :  { %162 = vset.pattern.permute.xlu0 %v244_v3  ;;  %164 = vset.pattern.permute.xlu1 %v245_v4  ;;  %v57_v9 = vrot.slane %v46_v8, %v56_v7  ;;  %v73_v16 = vrot.slane %v46_v8, %v72_v10  ;;  %v83_v18 = vrot.slane %v46_v8, %v82_v12  ;;  %p219_p5 = por %p218_p4, %p217_p3 }
  0x2c   :  { %67 = vperm.xlu0 %162, %v45_v2   ;;  %87 = vperm.xlu1 %164, %v45_v2   ;;  %v93_v19 = vrot.slane %v46_v8, %v92_v14  ;;  %v106_v31 = vrot.slane %v47_v30, %v56_v7  ;;  %v122_v32 = vrot.slane %v47_v30, %v72_v10 }
  0x2d   :  { %v132_v37 = vrot.slane %v47_v30, %v82_v12  ;;  %p220_p6 = pnand %p219_p5, %p213_p2 }
  0x30   :  { %165 = vset.pattern.permute.xlu1 %v242_v0 }
  0xa6   :  { %v52_v11 = vpop.permute.xlu0 %51  ;;  %v78_v13 = vpop.permute.xlu1 %77 }
  0xa7   :  { %v58_v15 = vmul.f32 %v57_v9, %v52_v11  ;;  %v84_v24 = vmul.f32 %v83_v18, %v78_v13 }
  0xa9   :  { %v65_v22 = vadd.f32 %v152_v17, %v58_v15 }
  0xab   :  { %v68_v20 = vpop.permute.xlu0 %67  ;;  %v88_v21 = vpop.permute.xlu1 %87 }
  0xac   :  { %v74_v23 = vmul.f32 %v73_v16, %v68_v20  ;;  %v94_v26 = vmul.f32 %v93_v19, %v88_v21 }
  0xae   :  { %v75_v25 = vadd.f32 %v74_v23, %v65_v22 }
  0xb0   :  { %v85_v27 = vadd.f32 %v84_v24, %v75_v25 }
  0xb2   :  { %v95_v28 = vadd.f32 %v94_v26, %v85_v27 }
  0xb4   :  { %v96_v29 = vmax.f32 %v95_v28, 0.0 }
  0xb6   :  { %116 = vperm.xlu0 %162, %v96_v29   ;;  %100 = vperm.xlu1 %165, %v96_v29  }
  0xba   :  { %166 = vset.pattern.permute.xlu1 %v243_v1  ;;  %167 = vset.pattern.permute.xlu0 %v243_v1 }
  0xbb   :  { %126 = vperm.xlu1 %166, %v96_v29  }
 0x135   :  { %v117_v33 = vpop.permute.xlu0 %116  ;;  %v101_v35 = vpop.permute.xlu1 %100 }
 0x136   :  { %v107_v36 = vmul.f32 %v106_v31, %v101_v35  ;;  %v123_v38 = vmul.f32 %v122_v32, %v117_v33 }
 0x138   :  { %v114_v39 = vadd.f32 %v153_v34, %v107_v36 }
 0x13a   :  { %v124_v40 = vadd.f32 %v123_v38, %v114_v39  ;;  %v127_v41 = vpop.permute.xlu1 %126 }
 0x13b   :  { %v133_v42 = vmul.f32 %v132_v37, %v127_v41 }
 0x13d   :  { %v134_v43 = vadd.f32 %v133_v42, %v124_v40 }
 0x13f   :  { %135 = vst [vmem:[#allocation7] sm:$0xff] %v134_v43 }
 0x140   :  { %223 = shalt.err (!%p220_p6)
}
 0x141   :  { %s224_s23 = scalar_lea.hbm %s327_s5, 128 }
 0x142   :  { %p225_p7 = scmp.ne.s32.totalorder %s327_s5, %s224_s23  ;;  %p228_p8 = scmp.lt.u32.totalorder %s224_s23, %s327_s5 }
 0x144   :  { %p230_p9 = pnand %p228_p8, %p225_p7 }
 0x146   :  { %233 = shalt.err (!%p230_p9)
}
 0x147   :  { %145 = dma.vmem_to_hbm [thread:$0]  %s143_s21, 128, %s327_s5, [#allocation4]  }
 0x148   :  { %238 = dma.done.wait [#allocation4], 128  }
 0x149   :  { %239 = vsyncadd [#allocation4], 4294967168 }
 0x14a   :  { %149 = vsyncpa [#allocation3], 1 }
 0x14b   :  { %150 = vsyncpa [#allocation6], 1 }
 0x14c   :  { %151 = vsyncpa [#allocation4], 1 }

</bundles_post_ra>
